<compile_context>
chip_gen: v7x
topology: tpu7x:2x2x1
jax: 0.10.0
libtpu: 0.0.40
codegen_flags: <defaults>
</compile_context>

<pallas_src>
import math

import jax
import jax.numpy as jnp
from jax.experimental import pallas as pl
from jax.experimental.pallas import tpu as pltpu


# ----------------------------------------------------------------------------
# Shared cell math (used by both kernels).
# ----------------------------------------------------------------------------
def _lru_cell_math(h1, h2, w1, w2, wr, wq, bl, bg0, bg1):
    """One LRU cell step. h1,h2: f32 (B,H). w*: bf16. b*: f32. Returns f32 pair."""
    H = h1.shape[1]
    h1b = h1.astype(jnp.bfloat16)
    h2b = h2.astype(jnp.bfloat16)

    # p1 = h1 @ [ W_lin(h1 half) | W_gate0(h1 half) ]  -> (B, 5H)
    # p2 = h2 @ [ W_lin(h2 half) | W_gate1(h2 half) ]  -> (B, 5H)
    p1 = jnp.dot(h1b, w1, preferred_element_type=jnp.float32)
    p2 = jnp.dot(h2b, w2, preferred_element_type=jnp.float32)

    # g = sigmoid(lin(cat([h1, h2], dim=1)))
    g = jax.nn.sigmoid(p1[:, : 4 * H] + p2[:, : 4 * H] + bl)
    z0 = g[:, 0 * H:1 * H]
    z1 = g[:, 1 * H:2 * H]
    r = g[:, 2 * H:3 * H]
    q = g[:, 3 * H:4 * H]

    # h0_cap = tanh(gate0(cat([h1, h2 * r])));  h1 part already in p1[:, 4H:]
    h0_cap = jnp.tanh(
        p1[:, 4 * H:]
        + jnp.dot((h2 * r).astype(jnp.bfloat16), wr,
                  preferred_element_type=jnp.float32)
        + bg0)
    # h1_cap = tanh(gate1(cat([h2, h1 * q])));  h2 part already in p2[:, 4H:]
    h1_cap = jnp.tanh(
        p2[:, 4 * H:]
        + jnp.dot((h1 * q).astype(jnp.bfloat16), wq,
                  preferred_element_type=jnp.float32)
        + bg1)

    # z*cap + (1-z)*h  ==  h + z*(cap - h)   (one fewer multiply)
    o1 = h1 + z0 * (h1_cap - h1)
    o2 = h2 + z1 * (h0_cap - h2)
    return o1, o2


# ----------------------------------------------------------------------------
# Single-step kernel (matches the PyTorch module forward).
# ----------------------------------------------------------------------------
def lru_cell_kernel(h1_ref, h2_ref, w1_ref, w2_ref, wr_ref, wq_ref,
                    bl_ref, bg0_ref, bg1_ref, o1_ref, o2_ref):
    o1, o2 = _lru_cell_math(h1_ref[...], h2_ref[...],
                            w1_ref[...], w2_ref[...], wr_ref[...], wq_ref[...],
                            bl_ref[...], bg0_ref[...], bg1_ref[...])
    o1_ref[...] = o1
    o2_ref[...] = o2


def _pad_batch(x):
    b = x.shape[0]
    bp = ((b + 7) // 8) * 8
    if bp != b:
        x = jnp.pad(x, ((0, bp - b), (0, 0)))
    return x, b


def lru_cell_pallas(h1, h2, params):
    """Single LRUCell step. h1: (B, H) f32; h2: (B, H) f32 or None (-> zeros)."""
    if h2 is None:
        h2 = jnp.zeros_like(h1)
    h1p, B = _pad_batch(h1)
    h2p, _ = _pad_batch(h2)
    Bp, H = h1p.shape

    vmem = pl.BlockSpec(memory_space=pltpu.MemorySpace.VMEM)
    fn = pl.pallas_call(
        lru_cell_kernel,
        out_shape=(jax.ShapeDtypeStruct((Bp, H), jnp.float32),
                   jax.ShapeDtypeStruct((Bp, H), jnp.float32)),
        in_specs=[vmem] * 9,
        out_specs=(vmem, vmem),
    )
    o1, o2 = fn(h1p, h2p, *params)
    return o1[:B], o2[:B]


# ----------------------------------------------------------------------------
# Fused T-step recurrence: one pallas_call, weights resident, state in scratch.
# ----------------------------------------------------------------------------
def lru_seq_kernel(h1_ref, h2_ref, w1_ref, w2_ref, wr_ref, wq_ref,
                   bl_ref, bg0_ref, bg1_ref, o1_ref, o2_ref, h1_s, h2_s):
    t = pl.program_id(0)

    @pl.when(t == 0)
    def _():
        h1_s[...] = h1_ref[...]
        h2_s[...] = h2_ref[...]

    n1, n2 = _lru_cell_math(h1_s[...], h2_s[...],
                            w1_ref[...], w2_ref[...], wr_ref[...], wq_ref[...],
                            bl_ref[...], bg0_ref[...], bg1_ref[...])
    h1_s[...] = n1
    h2_s[...] = n2
    # Output block index is constant over the grid, so these blocks stay
    # resident in VMEM and are written back to HBM only once, after step T-1.
    o1_ref[...] = n1
    o2_ref[...] = n2


def lru_cell_sequence_pallas(h1, h2, params, num_steps):
    """Apply the LRU cell `num_steps` times inside one kernel (recurrent use).

    Weights/biases use constant index_maps -> DMA'd into VMEM once and reused;
    the hidden state is carried across grid iterations in VMEM scratch."""
    if h2 is None:
        h2 = jnp.zeros_like(h1)
    h1p, B = _pad_batch(h1)
    h2p, _ = _pad_batch(h2)
    Bp, H = h1p.shape
    w1, w2, wr, wq, bl, bg0, bg1 = params

    def const(shape):
        return pl.BlockSpec(shape, lambda t: (0, 0))

    fn = pl.pallas_call(
        lru_seq_kernel,
        out_shape=(jax.ShapeDtypeStruct((Bp, H), jnp.float32),
                   jax.ShapeDtypeStruct((Bp, H), jnp.float32)),
        grid_spec=pltpu.PrefetchScalarGridSpec(
            num_scalar_prefetch=0,
            grid=(num_steps,),
            in_specs=[const((Bp, H)), const((Bp, H)),
                      const((H, 5 * H)), const((H, 5 * H)),
                      const((H, H)), const((H, H)),
                      const((1, 4 * H)), const((1, H)), const((1, H))],
            out_specs=[const((Bp, H)), const((Bp, H))],
            scratch_shapes=[pltpu.VMEM((Bp, H), jnp.float32),
                            pltpu.VMEM((Bp, H), jnp.float32)]),
        compiler_params=pltpu.CompilerParams(
            dimension_semantics=("arbitrary",)),  # serial recurrence over T
    )
    o1, o2 = fn(h1p, h2p, w1, w2, wr, wq, bl, bg0, bg1)
    return o1[:B], o2[:B]


# ----------------------------------------------------------------------------
# Parameter init (mirrors LRUCell.reset_parameters) and packing for the kernel.
# ----------------------------------------------------------------------------
def init_raw_params(key, hidden_size):
    """PyTorch-layout weights, uniform(+-1/sqrt(H))."""
    stdv = 1.0 / math.sqrt(hidden_size)
    ks = jax.random.split(key, 6)
    H = hidden_size

    def u(k, shape):
        return jax.random.uniform(k, shape, jnp.float32, minval=-stdv, maxval=stdv)

    w_lin = u(ks[0], (4 * H, 2 * H))   # Linear(2H, 4H): weight (out, in)
    b_lin = u(ks[1], (4 * H,))
    w_g0 = u(ks[2], (H, 2 * H))
    b_g0 = u(ks[3], (H,))
    w_g1 = u(ks[4], (H, 2 * H))
    b_g1 = u(ks[5], (H,))
    return w_lin, b_lin, w_g0, b_g0, w_g1, b_g1


def pack_params(raw):
    """Transpose to (in, out), split the concat axis, fuse ungated weights, bf16."""
    w_lin, b_lin, w_g0, b_g0, w_g1, b_g1 = raw
    H = w_g0.shape[0]
    w_lin_t = w_lin.T          # (2H, 4H)
    w_g0_t = w_g0.T            # (2H, H)
    w_g1_t = w_g1.T            # (2H, H)

    wla, wlb = w_lin_t[:H], w_lin_t[H:]     # lin: h1 / h2 halves
    wg0a, wg0b = w_g0_t[:H], w_g0_t[H:]     # gate0: h1 / (h2*r) halves
    wg1a, wg1b = w_g1_t[:H], w_g1_t[H:]     # gate1: h2 / (h1*q) halves

    w1 = jnp.concatenate([wla, wg0a], axis=1).astype(jnp.bfloat16)  # (H, 5H)
    w2 = jnp.concatenate([wlb, wg1a], axis=1).astype(jnp.bfloat16)  # (H, 5H)
    wr = wg0b.astype(jnp.bfloat16)                                  # (H, H)
    wq = wg1b.astype(jnp.bfloat16)                                  # (H, H)
    return (w1, w2, wr, wq,
            b_lin.reshape(1, 4 * H), b_g0.reshape(1, H), b_g1.reshape(1, H))


# ----------------------------------------------------------------------------
# References.
# ----------------------------------------------------------------------------
def lru_cell_reference(h1, h2, params):
    """Pure-JAX reference mirroring the kernel math (bf16 matmuls, f32 accum)."""
    w1, w2, wr, wq, bl, bg0, bg1 = params
    return _lru_cell_math(h1, h2, w1, w2, wr, wq, bl, bg0, bg1)


def lru_cell_reference_f32(h1, h2, raw):
    """Full-f32 reference matching the PyTorch forward exactly."""
    w_lin, b_lin, w_g0, b_g0, w_g1, b_g1 = raw
    H = h1.shape[1]
    x = jnp.concatenate([h1, h2], axis=1)
    g = jax.nn.sigmoid(x @ w_lin.T + b_lin)
    z0, z1, r, q = g[:, :H], g[:, H:2 * H], g[:, 2 * H:3 * H], g[:, 3 * H:]
    h0_cap = jnp.tanh(jnp.concatenate([h1, h2 * r], axis=1) @ w_g0.T + b_g0)
    h1_cap = jnp.tanh(jnp.concatenate([h2, h1 * q], axis=1) @ w_g1.T + b_g1)
    return (z0 * h1_cap + (1.0 - z0) * h1,
            z1 * h0_cap + (1.0 - z1) * h2)


if __name__ == "__main__":
    B, H, T = 4, 128, 8  # small batch (padded to 8 sublanes inside), lane-aligned H

    key = jax.random.PRNGKey(0)
    k_h1, k_h2, k_params = jax.random.split(key, 3)
    h1 = jax.random.normal(k_h1, (B, H), jnp.float32)
    h2 = jax.random.normal(k_h2, (B, H), jnp.float32)

    raw = init_raw_params(k_params, H)
    params = pack_params(raw)

    # --- single step (module forward) ---
    o1, o2 = lru_cell_pallas(h1, h2, params)
    jax.block_until_ready((o1, o2))

    r1, r2 = lru_cell_reference(h1, h2, params)        # bf16-matmul mirror
    f1, f2 = lru_cell_reference_f32(h1, h2, raw)       # exact f32 semantics
    assert jnp.allclose(o1, r1, atol=1e-3, rtol=1e-3)
    assert jnp.allclose(o2, r2, atol=1e-3, rtol=1e-3)
    assert jnp.allclose(o1, f1, atol=5e-2)             # bf16 quantization bound
    assert jnp.allclose(o2, f2, atol=5e-2)

    # --- fused T-step recurrence (weights resident, state in VMEM scratch) ---
    s1, s2 = lru_cell_sequence_pallas(h1, h2, params, T)
    jax.block_until_ready((s1, s2))

    e1, e2 = h1, h2
    for _ in range(T):
        e1, e2 = lru_cell_reference(e1, e2, params)
    assert jnp.allclose(s1, e1, atol=2e-3, rtol=2e-3)
    assert jnp.allclose(s2, e2, atol=2e-3, rtol=2e-3)

    print("KERNEL_OK")
</pallas_src>

<mosaic_0001>
module attributes {stable_mosaic.version = 11 : i64} {
  func.func @lru_cell_kernel(%arg0: memref<8x128xf32, #tpu.memory_space<vmem>>, %arg1: memref<8x128xf32, #tpu.memory_space<vmem>>, %arg2: memref<128x640xbf16, #tpu.memory_space<vmem>>, %arg3: memref<128x640xbf16, #tpu.memory_space<vmem>>, %arg4: memref<128x128xbf16, #tpu.memory_space<vmem>>, %arg5: memref<128x128xbf16, #tpu.memory_space<vmem>>, %arg6: memref<1x512xf32, #tpu.memory_space<vmem>>, %arg7: memref<1x128xf32, #tpu.memory_space<vmem>>, %arg8: memref<1x128xf32, #tpu.memory_space<vmem>>, %arg9: memref<8x128xf32, #tpu.memory_space<vmem>>, %arg10: memref<8x128xf32, #tpu.memory_space<vmem>>) attributes {dimension_semantics = [], scalar_prefetch = 0 : i64, scratch_operands = 0 : i64, tpu.core_type = #tpu.core_type<tc>} {
    %c0 = arith.constant 0 : index
    %c0_0 = arith.constant 0 : index
    %0 = vector.load %arg0[%c0, %c0_0] : memref<8x128xf32, #tpu.memory_space<vmem>>, vector<8x128xf32>
    %c0_1 = arith.constant 0 : index
    %c0_2 = arith.constant 0 : index
    %1 = vector.load %arg1[%c0_1, %c0_2] : memref<8x128xf32, #tpu.memory_space<vmem>>, vector<8x128xf32>
    %c0_3 = arith.constant 0 : index
    %c0_4 = arith.constant 0 : index
    %2 = vector.load %arg2[%c0_3, %c0_4] : memref<128x640xbf16, #tpu.memory_space<vmem>>, vector<128x640xbf16>
    %c0_5 = arith.constant 0 : index
    %c0_6 = arith.constant 0 : index
    %3 = vector.load %arg3[%c0_5, %c0_6] : memref<128x640xbf16, #tpu.memory_space<vmem>>, vector<128x640xbf16>
    %c0_7 = arith.constant 0 : index
    %c0_8 = arith.constant 0 : index
    %4 = vector.load %arg4[%c0_7, %c0_8] : memref<128x128xbf16, #tpu.memory_space<vmem>>, vector<128x128xbf16>
    %c0_9 = arith.constant 0 : index
    %c0_10 = arith.constant 0 : index
    %5 = vector.load %arg5[%c0_9, %c0_10] : memref<128x128xbf16, #tpu.memory_space<vmem>>, vector<128x128xbf16>
    %c0_11 = arith.constant 0 : index
    %c0_12 = arith.constant 0 : index
    %6 = vector.load %arg6[%c0_11, %c0_12] : memref<1x512xf32, #tpu.memory_space<vmem>>, vector<1x512xf32>
    %c0_13 = arith.constant 0 : index
    %c0_14 = arith.constant 0 : index
    %7 = vector.load %arg7[%c0_13, %c0_14] : memref<1x128xf32, #tpu.memory_space<vmem>>, vector<1x128xf32>
    %c0_15 = arith.constant 0 : index
    %c0_16 = arith.constant 0 : index
    %8 = vector.load %arg8[%c0_15, %c0_16] : memref<1x128xf32, #tpu.memory_space<vmem>>, vector<1x128xf32>
    %9 = arith.truncf %0 : vector<8x128xf32> to vector<8x128xbf16>
    %10 = arith.truncf %1 : vector<8x128xf32> to vector<8x128xbf16>
    %cst = arith.constant dense<0.000000e+00> : vector<8x640xf32>
    %11 = tpu.matmul %9, %2, %cst {dimension_numbers = #tpu.dot_dimension_numbers<[1], [0], [0], [1], [0, 0, 1, 1], [], []>} : vector<8x128xbf16>, vector<128x640xbf16>, vector<8x640xf32> -> vector<8x640xf32>
    %cst_17 = arith.constant dense<0.000000e+00> : vector<8x640xf32>
    %12 = tpu.matmul %10, %3, %cst_17 {dimension_numbers = #tpu.dot_dimension_numbers<[1], [0], [0], [1], [0, 0, 1, 1], [], []>} : vector<8x128xbf16>, vector<128x640xbf16>, vector<8x640xf32> -> vector<8x640xf32>
    %13 = vector.extract_strided_slice %11 {offsets = [0, 0], sizes = [8, 512], strides = [1, 1]} : vector<8x640xf32> to vector<8x512xf32>
    %14 = vector.extract_strided_slice %12 {offsets = [0, 0], sizes = [8, 512], strides = [1, 1]} : vector<8x640xf32> to vector<8x512xf32>
    %15 = arith.addf %13, %14 : vector<8x512xf32>
    %16 = vector.broadcast %6 : vector<1x512xf32> to vector<8x512xf32>
    %17 = arith.addf %15, %16 : vector<8x512xf32>
    %18 = arith.negf %17 : vector<8x512xf32>
    %19 = math.exp %18 : vector<8x512xf32>
    %cst_18 = arith.constant 1.000000e+00 : f32
    %20 = vector.broadcast %cst_18 : f32 to vector<8x512xf32>
    %21 = arith.addf %20, %19 : vector<8x512xf32>
    %22 = arith.divf %20, %21 : vector<8x512xf32>
    %23 = vector.extract_strided_slice %22 {offsets = [0, 0], sizes = [8, 128], strides = [1, 1]} : vector<8x512xf32> to vector<8x128xf32>
    %24 = vector.extract_strided_slice %22 {offsets = [0, 128], sizes = [8, 128], strides = [1, 1]} : vector<8x512xf32> to vector<8x128xf32>
    %25 = vector.extract_strided_slice %22 {offsets = [0, 256], sizes = [8, 128], strides = [1, 1]} : vector<8x512xf32> to vector<8x128xf32>
    %26 = vector.extract_strided_slice %22 {offsets = [0, 384], sizes = [8, 128], strides = [1, 1]} : vector<8x512xf32> to vector<8x128xf32>
    %27 = vector.extract_strided_slice %11 {offsets = [0, 512], sizes = [8, 128], strides = [1, 1]} : vector<8x640xf32> to vector<8x128xf32>
    %28 = arith.mulf %1, %25 : vector<8x128xf32>
    %29 = arith.truncf %28 : vector<8x128xf32> to vector<8x128xbf16>
    %cst_19 = arith.constant dense<0.000000e+00> : vector<8x128xf32>
    %30 = tpu.matmul %29, %4, %cst_19 {dimension_numbers = #tpu.dot_dimension_numbers<[1], [0], [0], [1], [0, 0, 1, 1], [], []>} : vector<8x128xbf16>, vector<128x128xbf16>, vector<8x128xf32> -> vector<8x128xf32>
    %31 = arith.addf %27, %30 : vector<8x128xf32>
    %32 = vector.broadcast %7 : vector<1x128xf32> to vector<8x128xf32>
    %33 = arith.addf %31, %32 : vector<8x128xf32>
    %34 = math.tanh %33 : vector<8x128xf32>
    %35 = vector.extract_strided_slice %12 {offsets = [0, 512], sizes = [8, 128], strides = [1, 1]} : vector<8x640xf32> to vector<8x128xf32>
    %36 = arith.mulf %0, %26 : vector<8x128xf32>
    %37 = arith.truncf %36 : vector<8x128xf32> to vector<8x128xbf16>
    %cst_20 = arith.constant dense<0.000000e+00> : vector<8x128xf32>
    %38 = tpu.matmul %37, %5, %cst_20 {dimension_numbers = #tpu.dot_dimension_numbers<[1], [0], [0], [1], [0, 0, 1, 1], [], []>} : vector<8x128xbf16>, vector<128x128xbf16>, vector<8x128xf32> -> vector<8x128xf32>
    %39 = arith.addf %35, %38 : vector<8x128xf32>
    %40 = vector.broadcast %8 : vector<1x128xf32> to vector<8x128xf32>
    %41 = arith.addf %39, %40 : vector<8x128xf32>
    %42 = math.tanh %41 : vector<8x128xf32>
    %43 = arith.subf %42, %0 : vector<8x128xf32>
    %44 = arith.mulf %23, %43 : vector<8x128xf32>
    %45 = arith.addf %0, %44 : vector<8x128xf32>
    %46 = arith.subf %34, %1 : vector<8x128xf32>
    %47 = arith.mulf %24, %46 : vector<8x128xf32>
    %48 = arith.addf %1, %47 : vector<8x128xf32>
    %c0_21 = arith.constant 0 : index
    %c0_22 = arith.constant 0 : index
    %49 = vector.load %arg9[%c0_21, %c0_22] : memref<8x128xf32, #tpu.memory_space<vmem>>, vector<8x128xf32>
    tpu.vector_store %arg9[%c0_21, %c0_22], %45 {strides = array<i32>} : memref<8x128xf32, #tpu.memory_space<vmem>>, vector<8x128xf32>,
    %c0_23 = arith.constant 0 : index
    %c0_24 = arith.constant 0 : index
    %50 = vector.load %arg10[%c0_23, %c0_24] : memref<8x128xf32, #tpu.memory_space<vmem>>, vector<8x128xf32>
    tpu.vector_store %arg10[%c0_23, %c0_24], %48 {strides = array<i32>} : memref<8x128xf32, #tpu.memory_space<vmem>>, vector<8x128xf32>,
    return
  }
}

</mosaic_0001>

<bundles_post_ra>
// kernel: tpu_custom_call.1
= control target key start
LH: loop header
LB: loop body
LE: loop exit
PB: predicated region body
PF: predicated region fallthrough
CT: control target
= control target key end

     0   :  { %16 = vsyncpa [#allocation3], 0  ;;  %s2037_s0 = inlined_call_operand.hbm [shape: f32[8,128], index: 0, kind: input, shape index: {}]   ;;  %s2038_s1 = inlined_call_operand.hbm [shape: f32[8,128], index: 1, kind: input, shape index: {}]   ;;  %s2039_s2 = inlined_call_operand.hbm [shape: bf16[128,640], index: 2, kind: input, shape index: {}]   ;;  %s2040_s3 = inlined_call_operand.hbm [shape: bf16[128,640], index: 3, kind: input, shape index: {}]   ;;  %s2041_s4 = inlined_call_operand.hbm [shape: bf16[128,128], index: 4, kind: input, shape index: {}]   ;;  %s2042_s5 = inlined_call_operand.hbm [shape: bf16[128,128], index: 5, kind: input, shape index: {}]   ;;  %s2043_s6 = inlined_call_operand.vmem [shape: f32[1,512], index: 6, kind: input, shape index: {}]   ;;  %s2044_s7 = inlined_call_operand.vmem [shape: f32[1,128], index: 7, kind: input, shape index: {}]   ;;  %s2045_s8 = inlined_call_operand.vmem [shape: f32[1,128], index: 8, kind: input, shape index: {}]   ;;  %s2046_s9 = inlined_call_operand.hbm [shape: f32[8,128], index: 9, kind: output, shape index: {0}]   ;;  %s2047_s10 = inlined_call_operand.hbm [shape: f32[8,128], index: 10, kind: output, shape index: {1}]  }
   0x1   :  { %17 = vsyncpa [#allocation6], 0 }
   0x2   :  { %18 = vsyncpa [#allocation9], 0 }
   0x3   :  { %19 = vsyncpa [#allocation12], 0 }
   0x4   :  { %20 = vsyncpa [#allocation4], 0 }
   0x5   :  { %21 = vsyncpa [#allocation15], 0  ;;  %s1770_s13 = smov [#allocation5]   ;;  %s1582_s17 = scalar_lea.hbm %s2038_s1, 128 }
   0x6   :  { %s38_s14 = sshll.u32 %s1770_s13, 4  ;;  %p1583_p0 = scmp.ne.s32.totalorder %s2038_s1, %s1582_s17  ;;  %s39_s14 = int_to_ptr.vmem [resolvable:$true] %s38_s14 }
   0x7   :  { %p1586_p1 = scmp.lt.u32.totalorder %s1582_s17, %s2038_s1 }
   0x9   :  { %p1588_p2 = pnand %p1586_p1, %p1583_p0 }
   0xb   :  { %1591 = shalt.err (!%p1588_p2)
}
   0xc   :  { %s1592_s22 = scalar_lea.vmem %s39_s14, 128  ;;  %p1597_p4 = scmp.lt.s32.totalorder %s39_s14, %s39_s14 }
   0xd   :  { %p1593_p3 = scmp.ne.s32.totalorder %s39_s14, %s1592_s22  ;;  %p1598_p5 = scmp.lt.s32.totalorder %s1592_s22, %s1592_s22 }
   0xf   :  { %p1599_p6 = por %p1598_p5, %p1597_p4 }
  0x11   :  { %p1600_p7 = pnand %p1599_p6, %p1593_p3 }
  0x13   :  { %1603 = shalt.err (!%p1600_p7)
}
  0x14   :  { %41 = dma.hbm_to_vmem [thread:$0]  %s2038_s1, 128, %s39_s14, [#allocation6]  }
  0x15   :  { %s1771_s25 = smov [#allocation8]   ;;  %s1772_s27 = smov [#allocation2]  }
  0x16   :  { %s59_s26 = sshll.u32 %s1771_s25, 4  ;;  %s28_s28 = sshll.u32 %s1772_s27, 4  ;;  %s60_s26 = int_to_ptr.vmem [resolvable:$true] %s59_s26  ;;  %s29_s28 = int_to_ptr.vmem [resolvable:$true] %s28_s28 }
  0x17   :  { %s1604_s11 = scalar_lea.hbm %s2040_s3, 5120 }
  0x18   :  { %p1605_p8 = scmp.ne.s32.totalorder %s2040_s3, %s1604_s11  ;;  %p1608_p9 = scmp.lt.u32.totalorder %s1604_s11, %s2040_s3 }
  0x1a   :  { %p1610_p10 = pnand %p1608_p9, %p1605_p8 }
  0x1c   :  { %1613 = shalt.err (!%p1610_p10)
}
  0x1d   :  { %s1614_s1 = scalar_lea.vmem %s60_s26, 5120  ;;  %p1619_p12 = scmp.lt.s32.totalorder %s60_s26, %s60_s26 }
  0x1e   :  { %p1615_p11 = scmp.ne.s32.totalorder %s60_s26, %s1614_s1  ;;  %p1620_p13 = scmp.lt.s32.totalorder %s1614_s1, %s1614_s1 }
  0x20   :  { %p1621_p0 = por %p1620_p13, %p1619_p12 }
  0x22   :  { %p1622_p1 = pnand %p1621_p0, %p1615_p11 }
  0x24   :  { %1625 = shalt.err (!%p1622_p1)
}
  0x25   :  { %s1773_s14 = smov 320   ;;  %s1774_s17 = smov 20  }
  0x26   :  { %65 = dma.hbm_to_vmem [thread:$0]  %s2040_s3, 5120, %s60_s26, [#allocation9], %s1773_s14, %s1773_s14, %s1774_s17  }
  0x27   :  { %s1626_s22 = scalar_lea.hbm %s2037_s0, 128 }
  0x28   :  { %p1627_p2 = scmp.ne.s32.totalorder %s2037_s0, %s1626_s22  ;;  %p1630_p3 = scmp.lt.u32.totalorder %s1626_s22, %s2037_s0 }
  0x2a   :  { %p1632_p4 = pnand %p1630_p3, %p1627_p2 }
  0x2c   :  { %1635 = shalt.err (!%p1632_p4)
}
  0x2d   :  { %s1636_s29 = scalar_lea.vmem %s29_s28, 128  ;;  %p1641_p6 = scmp.lt.s32.totalorder %s29_s28, %s29_s28 }
  0x2e   :  { %p1637_p5 = scmp.ne.s32.totalorder %s29_s28, %s1636_s29  ;;  %p1642_p7 = scmp.lt.s32.totalorder %s1636_s29, %s1636_s29 }
  0x30   :  { %p1643_p8 = por %p1642_p7, %p1641_p6 }
  0x32   :  { %p1644_p9 = pnand %p1643_p8, %p1637_p5 }
  0x34   :  { %1647 = shalt.err (!%p1644_p9)
}
  0x35   :  { %31 = dma.hbm_to_vmem [thread:$0]  %s2037_s0, 128, %s29_s28, [#allocation3]  }
  0x36   :  { %s1775_s30 = smov [#allocation7]   ;;  %s1776_s12 = smov [#allocation10]  }
  0x37   :  { %s47_s11 = sshll.u32 %s1775_s30, 4  ;;  %s71_s13 = sshll.u32 %s1776_s12, 4  ;;  %s48_s11 = int_to_ptr.vmem [resolvable:$true] %s47_s11  ;;  %s72_s13 = int_to_ptr.vmem [resolvable:$true] %s71_s13 }
  0x38   :  { %s1648_s1 = scalar_lea.hbm %s2039_s2, 5120 }
  0x39   :  { %p1649_p10 = scmp.ne.s32.totalorder %s2039_s2, %s1648_s1  ;;  %p1652_p11 = scmp.lt.u32.totalorder %s1648_s1, %s2039_s2 }
  0x3b   :  { %p1654_p12 = pnand %p1652_p11, %p1649_p10 }
  0x3d   :  { %1657 = shalt.err (!%p1654_p12)
}
  0x3e   :  { %s1658_s0 = scalar_lea.vmem %s48_s11, 5120  ;;  %p1663_p0 = scmp.lt.s32.totalorder %s48_s11, %s48_s11 }
  0x3f   :  { %p1659_p13 = scmp.ne.s32.totalorder %s48_s11, %s1658_s0  ;;  %p1664_p1 = scmp.lt.s32.totalorder %s1658_s0, %s1658_s0 }
  0x41   :  { %p1665_p2 = por %p1664_p1, %p1663_p0 }
  0x43   :  { %p1666_p3 = pnand %p1665_p2, %p1659_p13 }
  0x45   :  { %1669 = shalt.err (!%p1666_p3)
}
  0x46   :  { %53 = dma.hbm_to_vmem [thread:$0]  %s2039_s2, 5120, %s48_s11, [#allocation6], %s1773_s14, %s1773_s14, %s1774_s17  }
  0x47   :  { %s1670_s25 = scalar_lea.hbm %s2041_s4, 1024 }
  0x48   :  { %p1671_p4 = scmp.ne.s32.totalorder %s2041_s4, %s1670_s25  ;;  %p1674_p5 = scmp.lt.u32.totalorder %s1670_s25, %s2041_s4 }
  0x4a   :  { %p1676_p6 = pnand %p1674_p5, %p1671_p4 }
  0x4c   :  { %1679 = shalt.err (!%p1676_p6)
}
  0x4d   :  { %s1680_s30 = scalar_lea.vmem %s72_s13, 1024  ;;  %p1685_p8 = scmp.lt.s32.totalorder %s72_s13, %s72_s13 }
  0x4e   :  { %p1681_p7 = scmp.ne.s32.totalorder %s72_s13, %s1680_s30  ;;  %p1686_p9 = scmp.lt.s32.totalorder %s1680_s30, %s1680_s30 }
  0x50   :  { %p1687_p10 = por %p1686_p9, %p1685_p8 }
  0x52   :  { %p1688_p11 = pnand %p1687_p10, %p1681_p7 }
  0x54   :  { %1691 = shalt.err (!%p1688_p11)
}
  0x55   :  { %s1777_s2 = smov 64   ;;  %s1778_s14 = smov 4  }
  0x56   :  { %77 = dma.hbm_to_vmem [thread:$0]  %s2041_s4, 1024, %s72_s13, [#allocation9], %s1777_s2, %s1777_s2, %s1778_s14  }
  0x57   :  { %s1779_s12 = smov [#allocation11]   ;;  %s1692_s18 = scalar_lea.hbm %s2042_s5, 1024 }
  0x58   :  { %s83_s15 = sshll.u32 %s1779_s12, 4  ;;  %p1693_p12 = scmp.ne.s32.totalorder %s2042_s5, %s1692_s18  ;;  %s84_s15 = int_to_ptr.vmem [resolvable:$true] %s83_s15 }
  0x59   :  { %p1696_p13 = scmp.lt.u32.totalorder %s1692_s18, %s2042_s5 }
  0x5b   :  { %p1698_p0 = pnand %p1696_p13, %p1693_p12 }
  0x5d   :  { %1701 = shalt.err (!%p1698_p0)
}
  0x5e   :  { %s1702_s28 = scalar_lea.vmem %s84_s15, 1024  ;;  %p1707_p2 = scmp.lt.s32.totalorder %s84_s15, %s84_s15 }
  0x5f   :  { %p1703_p1 = scmp.ne.s32.totalorder %s84_s15, %s1702_s28  ;;  %p1708_p3 = scmp.lt.s32.totalorder %s1702_s28, %s1702_s28 }
  0x61   :  { %p1709_p4 = por %p1708_p3, %p1707_p2 }
  0x63   :  { %p1710_p5 = pnand %p1709_p4, %p1703_p1 }
  0x65   :  { %1713 = shalt.err (!%p1710_p5)
}
  0x66   :  { %89 = dma.hbm_to_vmem [thread:$0]  %s2042_s5, 1024, %s84_s15, [#allocation12], %s1777_s2, %s1777_s2, %s1778_s14  }
  0x67   :  { %1758 = dma.done.wait [#allocation3], 128  }
  0x68   :  { %1759 = vsyncadd [#allocation3], 4294967168 }
  0x69   :  { %1760 = dma.done.wait [#allocation6], 5248  }
  0x6a   :  { %1761 = vsyncadd [#allocation6], 4294962048 }
  0x6b   :  { %1762 = dma.done.wait [#allocation9], 6144  }
  0x6c   :  { %1763 = vsyncadd [#allocation9], 4294961152 }
  0x6d   :  { %1764 = dma.done.wait [#allocation12], 1024  }
  0x6e   :  { %1765 = vsyncadd [#allocation12], 4294966272  ;;  %v1780_v0 = vmov 0   ;;  %v1434_v1 = vld [vmem:[#allocation7 + $0x4] ss:$20 sps:$4 sm:$0xff]   ;;  %v1920_v33 = vld [vmem:[#allocation2] sm:$0xff] }
  0x6f   :  { %490 = vmatprep.mubr.bf16.mxu0 %v1780_v0  ;;  %531 = vmatprep.mubr.bf16.mxu1 %v1780_v0  ;;  %v1436_v2 = vld [vmem:[#allocation7 + $0xc] ss:$20 sps:$4 sm:$0xff]   ;;  %v1439_v4 = vld [vmem:[#allocation7 + $0x8] ss:$20 sps:$4 sm:$0xff]   ;;  %v1445_v8 = vld [vmem:[#allocation7 + $0x30] ss:$20 sps:$4 sm:$0xff]   ;;  %v1924_v35 = vpack.c.bf16 %v1920_v33, %v1920_v33 }
  0x70   :  { %458 = vmatprep.subr.bf16.mxu0 %v1434_v1  ;;  %v1438_v3 = vld [vmem:[#allocation7] ss:$20 sps:$4 sm:$0xff]   ;;  %499 = vmatprep.subr.bf16.mxu1 %v1436_v2  ;;  %v1444_v7 = vld [vmem:[#allocation7 + $0x28] ss:$20 sps:$4 sm:$0xff]   ;;  %v1450_v11 = vld [vmem:[#allocation7 + $0x50] ss:$20 sps:$4 sm:$0xff]  }
  0x71   :  { %v1440_v5 = vld [vmem:[#allocation7 + $0x2c] ss:$20 sps:$4 sm:$0xff]   ;;  %459 = vmatpush1.bf16.msra.mxu0 %v1438_v3  ;;  %500 = vmatpush1.bf16.msra.mxu1 %v1439_v4  ;;  %v1442_v6 = vld [vmem:[#allocation7 + $0x34] ss:$20 sps:$4 sm:$0xff]   ;;  %v1448_v10 = vld [vmem:[#allocation7 + $0x5c] ss:$20 sps:$4 sm:$0xff]  }
  0x72   :  { %460 = vmatprep.subr.bf16.mxu0 %v1440_v5  ;;  %501 = vmatprep.subr.bf16.mxu1 %v1442_v6  ;;  %v1446_v9 = vld [vmem:[#allocation7 + $0x54] ss:$20 sps:$4 sm:$0xff]   ;;  %v1451_v12 = vld [vmem:[#allocation7 + $0x58] ss:$20 sps:$4 sm:$0xff]   ;;  %v1452_v13 = vld [vmem:[#allocation7 + $0x7c] ss:$20 sps:$4 sm:$0xff]  }
  0x73   :  { %v1454_v14 = vld [vmem:[#allocation7 + $0x84] ss:$20 sps:$4 sm:$0xff]   ;;  %v1457_v16 = vld [vmem:[#allocation7 + $0x80] ss:$20 sps:$4 sm:$0xff]   ;;  %v1463_v20 = vld [vmem:[#allocation7 + $0xa8] ss:$20 sps:$4 sm:$0xff]  }
  0x74   :  { %v1456_v15 = vld [vmem:[#allocation7 + $0x78] ss:$20 sps:$4 sm:$0xff]   ;;  %v1462_v19 = vld [vmem:[#allocation7 + $0xa0] ss:$20 sps:$4 sm:$0xff]   ;;  %v1468_v23 = vld [vmem:[#allocation7 + $0xc8] ss:$20 sps:$4 sm:$0xff]  }
  0x75   :  { %461 = vmatpush1.bf16.msra.mxu0 %v1444_v7  ;;  %502 = vmatpush1.bf16.msra.mxu1 %v1445_v8  ;;  %v1458_v17 = vld [vmem:[#allocation7 + $0xa4] ss:$20 sps:$4 sm:$0xff]   ;;  %v1460_v18 = vld [vmem:[#allocation7 + $0xac] ss:$20 sps:$4 sm:$0xff]   ;;  %v1466_v22 = vld [vmem:[#allocation7 + $0xd4] ss:$20 sps:$4 sm:$0xff]  }
  0x76   :  { %462 = vmatprep.subr.bf16.mxu0 %v1446_v9  ;;  %503 = vmatprep.subr.bf16.mxu1 %v1448_v10  ;;  %v1464_v21 = vld [vmem:[#allocation7 + $0xcc] ss:$20 sps:$4 sm:$0xff]   ;;  %v1469_v24 = vld [vmem:[#allocation7 + $0xd0] ss:$20 sps:$4 sm:$0xff]   ;;  %v1470_v25 = vld [vmem:[#allocation7 + $0xf4] ss:$20 sps:$4 sm:$0xff]  }
  0x77   :  { %v1472_v26 = vld [vmem:[#allocation7 + $0xfc] ss:$20 sps:$4 sm:$0xff]   ;;  %v1475_v28 = vld [vmem:[#allocation7 + $0xf8] ss:$20 sps:$4 sm:$0xff]   ;;  %v1481_v32 = vld [vmem:[#allocation7 + $0x120] ss:$20 sps:$4 sm:$0xff]  }
  0x78   :  { %v1474_v27 = vld [vmem:[#allocation7 + $0xf0] ss:$20 sps:$4 sm:$0xff]   ;;  %v1480_v31 = vld [vmem:[#allocation7 + $0x118] ss:$20 sps:$4 sm:$0xff]   ;;  %v1482_v36 = vld [vmem:[#allocation8] ss:$20 sps:$4 sm:$0xff]  }
  0x79   :  { %463 = vmatpush1.bf16.msra.mxu0 %v1450_v11  ;;  %504 = vmatpush1.bf16.msra.mxu1 %v1451_v12  ;;  %v1476_v29 = vld [vmem:[#allocation7 + $0x11c] ss:$20 sps:$4 sm:$0xff]   ;;  %v1478_v30 = vld [vmem:[#allocation7 + $0x124] ss:$20 sps:$4 sm:$0xff]   ;;  %v1781_v38 = vmov 0.0   ;;  %vm1782_vm0 = vmmov 0  }
  0x7a   :  { %464 = vmatprep.subr.bf16.mxu0 %v1452_v13  ;;  %505 = vmatprep.subr.bf16.mxu1 %v1454_v14  ;;  %v1484_v34 = vld [vmem:[#allocation8 + $0x4] ss:$20 sps:$4 sm:$0xff]   ;;  %v1488_v39 = vld [vmem:[#allocation8 + $0x2c] ss:$20 sps:$4 sm:$0xff]   ;;  %v1486_v40 = vld [vmem:[#allocation8 + $0x28] ss:$20 sps:$4 sm:$0xff]   ;;  %v915_v14 = vlaneseq }
  0x7b   :  { %v1485_v37 = vld [vmem:[#allocation7 + $0x10] ss:$20 sps:$4 sm:$0xff]   ;;  %v1489_v41 = vld [vmem:[#allocation7 + $0x38] ss:$20 sps:$4 sm:$0xff]   ;;  %v1492_v42 = vld [vmem:[#allocation8 + $0x54] ss:$20 sps:$4 sm:$0xff]  }
  0x7c   :  { %v1490_v43 = vld [vmem:[#allocation8 + $0x50] ss:$20 sps:$4 sm:$0xff]   ;;  %v1493_v44 = vld [vmem:[#allocation7 + $0x60] ss:$20 sps:$4 sm:$0xff]   ;;  %v1494_v46 = vld [vmem:[#allocation8 + $0x78] ss:$20 sps:$4 sm:$0xff]  }
  0x7d   :  { %465 = vmatpush1.bf16.msra.mxu0 %v1456_v15  ;;  %506 = vmatpush1.bf16.msra.mxu1 %v1457_v16  ;;  %v1496_v45 = vld [vmem:[#allocation8 + $0x7c] ss:$20 sps:$4 sm:$0xff]   ;;  %v1500_v48 = vld [vmem:[#allocation8 + $0xa4] ss:$20 sps:$4 sm:$0xff]   ;;  %v1498_v49 = vld [vmem:[#allocation8 + $0xa0] ss:$20 sps:$4 sm:$0xff]  }
  0x7e   :  { %466 = vmatprep.subr.bf16.mxu0 %v1458_v17  ;;  %507 = vmatprep.subr.bf16.mxu1 %v1460_v18  ;;  %v1497_v47 = vld [vmem:[#allocation7 + $0x88] ss:$20 sps:$4 sm:$0xff]   ;;  %v1501_v50 = vld [vmem:[#allocation7 + $0xb0] ss:$20 sps:$4 sm:$0xff]   ;;  %v1504_v51 = vld [vmem:[#allocation8 + $0xcc] ss:$20 sps:$4 sm:$0xff]  }
  0x7f   :  { %v1502_v52 = vld [vmem:[#allocation8 + $0xc8] ss:$20 sps:$4 sm:$0xff]   ;;  %v1505_v53 = vld [vmem:[#allocation7 + $0xd8] ss:$20 sps:$4 sm:$0xff]   ;;  %v1506_v55 = vld [vmem:[#allocation8 + $0xf0] ss:$20 sps:$4 sm:$0xff]  }
  0x80   :  { %v1508_v54 = vld [vmem:[#allocation8 + $0xf4] ss:$20 sps:$4 sm:$0xff]   ;;  %v1512_v57 = vld [vmem:[#allocation8 + $0x11c] ss:$20 sps:$4 sm:$0xff]   ;;  %v1510_v58 = vld [vmem:[#allocation8 + $0x118] ss:$20 sps:$4 sm:$0xff]  }
  0x81   :  { %467 = vmatpush1.bf16.msra.mxu0 %v1462_v19  ;;  %508 = vmatpush1.bf16.msra.mxu1 %v1463_v20  ;;  %v1509_v56 = vld [vmem:[#allocation7 + $0x100] ss:$20 sps:$4 sm:$0xff]   ;;  %v1513_v59 = vld [vmem:[#allocation7 + $0x128] ss:$20 sps:$4 sm:$0xff]   ;;  %v1517_v2 = vld [vmem:[#allocation8 + $0x30] ss:$20 sps:$4 sm:$0xff]  }
  0x82   :  { %468 = vmatprep.subr.bf16.mxu0 %v1464_v21  ;;  %509 = vmatprep.subr.bf16.mxu1 %v1466_v22  ;;  %v1938_v60 = vld [vmem:[#allocation5] sm:$0xff]  ;;  %v1516_v61 = vld [vmem:[#allocation8 + $0xc] ss:$20 sps:$4 sm:$0xff]   ;;  %v1519_v1 = vld [vmem:[#allocation8 + $0x34] ss:$20 sps:$4 sm:$0xff]   ;;  %v1955_v15 = vshrl.u32 %v915_v14, 7 }
  0x83   :  { %v1514_v62 = vld [vmem:[#allocation8 + $0x8] ss:$20 sps:$4 sm:$0xff]   ;;  %v1943_v63 = vpack.c.bf16 %v1938_v60, %v1938_v60  ;;  %v1520_v4 = vld [vmem:[#allocation8 + $0x58] ss:$20 sps:$4 sm:$0xff]   ;;  %v1523_v6 = vld [vmem:[#allocation8 + $0x80] ss:$20 sps:$4 sm:$0xff]  }
  0x84   :  { %v1522_v3 = vld [vmem:[#allocation8 + $0x5c] ss:$20 sps:$4 sm:$0xff]   ;;  %v1525_v5 = vld [vmem:[#allocation8 + $0x84] ss:$20 sps:$4 sm:$0xff]   ;;  %v1528_v7 = vld [vmem:[#allocation8 + $0xac] ss:$20 sps:$4 sm:$0xff]  }
  0x85   :  { %469 = vmatpush1.bf16.msra.mxu0 %v1468_v23  ;;  %510 = vmatpush1.bf16.msra.mxu1 %v1469_v24  ;;  %v1526_v8 = vld [vmem:[#allocation8 + $0xa8] ss:$20 sps:$4 sm:$0xff]   ;;  %v1529_v10 = vld [vmem:[#allocation8 + $0xd0] ss:$20 sps:$4 sm:$0xff]   ;;  %v1532_v11 = vld [vmem:[#allocation8 + $0xf8] ss:$20 sps:$4 sm:$0xff]  }
  0x86   :  { %470 = vmatprep.subr.bf16.mxu0 %v1470_v25  ;;  %511 = vmatprep.subr.bf16.mxu1 %v1472_v26  ;;  %v1531_v9 = vld [vmem:[#allocation8 + $0xd4] ss:$20 sps:$4 sm:$0xff]   ;;  %v1537_v12 = vld [vmem:[#allocation8 + $0x124] ss:$20 sps:$4 sm:$0xff]   ;;  %v917_v16 = vsub.s32 0, %v1955_v15  ;;  %v921_v18 = vsub.s32 1, %v1955_v15 }
  0x87   :  { %v1535_v13 = vld [vmem:[#allocation8 + $0x120] ss:$20 sps:$4 sm:$0xff]   ;;  %v1961_v17 = vld [vmem:[%s2043_s6] sm:$0xf]  ;;  %v1539_v22 = vld [vmem:[#allocation8 + $0x38] ss:$20 sps:$4 sm:$0xff]  }
  0x88   :  { %v1965_v19 = vrot.slane %v1961_v17, %v917_v16  ;;  %v1538_v20 = vld [vmem:[#allocation8 + $0x10] ss:$20 sps:$4 sm:$0xff]   ;;  %v1968_v21 = vrot.slane %v1961_v17, %v921_v18  ;;  %v1540_v23 = vld [vmem:[#allocation8 + $0x60] ss:$20 sps:$4 sm:$0xff]   ;;  %v1541_v24 = vld [vmem:[#allocation8 + $0x88] ss:$20 sps:$4 sm:$0xff]  }
  0x89   :  { %471 = vmatpush1.bf16.msra.mxu0 %v1474_v27  ;;  %512 = vmatpush1.bf16.msra.mxu1 %v1475_v28  ;;  %v1542_v25 = vld [vmem:[#allocation8 + $0xb0] ss:$20 sps:$4 sm:$0xff]   ;;  %v1543_v26 = vld [vmem:[#allocation8 + $0xd8] ss:$20 sps:$4 sm:$0xff]   ;;  %v1544_v27 = vld [vmem:[#allocation8 + $0x100] ss:$20 sps:$4 sm:$0xff]  }
  0x8a   :  { %472 = vmatprep.subr.bf16.mxu0 %v1476_v29  ;;  %513 = vmatprep.subr.bf16.mxu1 %v1478_v30  ;;  %v1545_v28 = vld [vmem:[#allocation8 + $0x128] ss:$20 sps:$4 sm:$0xff]   ;;  %v1546_v29 = vld [vmem:[#allocation10] sm:$0xff]   ;;  %s1784_s27 = smov [#allocation13]  }
  0x8b   :  { %v1547_v30 = vld [vmem:[#allocation11] sm:$0xff]   ;;  %s1175_s29 = sshll.u32 %s1784_s27, 4  ;;  %s1176_s29 = int_to_ptr.vmem [resolvable:$true] %s1175_s29 }
  0x8d   :  { %473 = vmatpush1.bf16.msra.mxu0 %v1480_v31  ;;  %514 = vmatpush1.bf16.msra.mxu1 %v1481_v32  ;;  %v1548_v31 = vld [vmem:[#allocation10 + $0x8] sm:$0xff]  }
  0x8e   :  { %1339 = vmatprep.subr.bf16.mxu0 %v1781_v38  ;;  %788 = vmatprep.subr.bf16.mxu1 %v1484_v34  ;;  %v1549_v32 = vld [vmem:[#allocation11 + $0x8] sm:$0xff]   ;;  %v1550_v34 = vld [vmem:[#allocation10 + $0x10] sm:$0xff]  }
  0x90   :  { %491 = vmatmul.mubr.bf16.vlgmr.msra.gmra.mrb[0].mxu0 %v1924_v35  ;;  %532 = vmatmul.mubr.bf16.vlgmr.msra.gmra.mrb[0].mxu1 %v1924_v35 }
  0x91   :  { %1340 = vmatpush3.bf16.msra.mxu0 %v1485_v37  ;;  %789 = vmatpush1.bf16.msra.mxu1 %v1482_v36  ;;  %v1552_v36 = vld [vmem:[#allocation10 + $0x18] sm:$0xff]  }
  0x92   :  { %1341 = vmatprep.subr.bf16.mxu0 %v1781_v38  ;;  %790 = vmatprep.subr.bf16.mxu1 %v1488_v39  ;;  %v1553_v37 = vld [vmem:[#allocation11 + $0x18] sm:$0xff]   ;;  %v1554_v39 = vld [vmem:[#allocation10 + $0x20] sm:$0xff]  }
  0x93   :  { %1355 = vmatprep.mubr.msk.bf16.mxu0 %vm1782_vm0, %v1781_v38  ;;  %820 = vmatprep.mubr.bf16.mxu1 %v1780_v0 }
  0x95   :  { %1342 = vmatpush3.bf16.msra.mxu0 %v1489_v41  ;;  %791 = vmatpush1.bf16.msra.mxu1 %v1486_v40  ;;  %v1555_v40 = vld [vmem:[#allocation11 + $0x20] sm:$0xff]   ;;  %v1556_v41 = vld [vmem:[#allocation10 + $0x28] sm:$0xff]  }
  0x96   :  { %1343 = vmatprep.subr.bf16.mxu0 %v1781_v38  ;;  %792 = vmatprep.subr.bf16.mxu1 %v1492_v42  ;;  %v1557_v42 = vld [vmem:[#allocation11 + $0x28] sm:$0xff]  }
  0x99   :  { %1344 = vmatpush3.bf16.msra.mxu0 %v1493_v44  ;;  %793 = vmatpush1.bf16.msra.mxu1 %v1490_v43  ;;  %v1558_v43 = vld [vmem:[#allocation10 + $0x30] sm:$0xff]  }
  0x9a   :  { %1345 = vmatprep.subr.bf16.mxu0 %v1781_v38  ;;  %794 = vmatprep.subr.bf16.mxu1 %v1496_v45  ;;  %v1559_v44 = vld [vmem:[#allocation11 + $0x30] sm:$0xff]   ;;  %v1560_v45 = vld [vmem:[#allocation10 + $0x38] sm:$0xff]  }
  0x9d   :  { %1346 = vmatpush3.bf16.msra.mxu0 %v1497_v47  ;;  %795 = vmatpush1.bf16.msra.mxu1 %v1494_v46  ;;  %v1561_v46 = vld [vmem:[#allocation11 + $0x38] sm:$0xff]  }
  0x9e   :  { %1347 = vmatprep.subr.bf16.mxu0 %v1781_v38  ;;  %796 = vmatprep.subr.bf16.mxu1 %v1500_v48 }
  0xa1   :  { %1348 = vmatpush3.bf16.msra.mxu0 %v1501_v50  ;;  %797 = vmatpush1.bf16.msra.mxu1 %v1498_v49 }
  0xa2   :  { %1349 = vmatprep.subr.bf16.mxu0 %v1781_v38  ;;  %798 = vmatprep.subr.bf16.mxu1 %v1504_v51 }
  0xa5   :  { %1350 = vmatpush3.bf16.msra.mxu0 %v1505_v53  ;;  %799 = vmatpush1.bf16.msra.mxu1 %v1502_v52 }
  0xa6   :  { %1351 = vmatprep.subr.bf16.mxu0 %v1781_v38  ;;  %800 = vmatprep.subr.bf16.mxu1 %v1508_v54 }
  0xa9   :  { %1352 = vmatpush3.bf16.msra.mxu0 %v1509_v56  ;;  %801 = vmatpush1.bf16.msra.mxu1 %v1506_v55 }
  0xaa   :  { %1353 = vmatprep.subr.bf16.mxu0 %v1781_v38  ;;  %802 = vmatprep.subr.bf16.mxu1 %v1512_v57 }
  0xad   :  { %1354 = vmatpush3.bf16.msra.mxu0 %v1513_v59  ;;  %803 = vmatpush1.bf16.msra.mxu1 %v1510_v58 }
  0xae   :  { %829 = vmatprep.subr.bf16.mxu0 %v1516_v61  ;;  %1359 = vmatprep.subr.bf16.mxu1 %v1781_v38 }
  0xb0   :  { %1356 = vmatmul.mubr.bf16.vlgmr.msra.gmra.mrb[4].mxu0 %v1924_v35  ;;  %821 = vmatmul.mubr.bf16.vlgmr.msra.gmra.mrb[4].mxu1 %v1943_v63  ;;  %v1551_v35 = vld [vmem:[#allocation11 + $0x10] sm:$0xff]  }
  0xb1   :  { %830 = vmatpush1.bf16.msra.mxu0 %v1514_v62  ;;  %861 = vmatprep.mubr.bf16.mxu0 %v1780_v0  ;;  %v1534_v0 = vld [vmem:[#allocation8 + $0xfc] ss:$20 sps:$4 sm:$0xff]  }
  0xb2   :  { %831 = vmatprep.subr.bf16.mxu0 %v1519_v1  ;;  %1375 = vmatprep.mubr.msk.bf16.mxu1 %vm1782_vm0, %v1781_v38 }
  0xb3   :  { %1360 = vmatpush3.bf16.msra.mxu1 %v1538_v20 }
  0xb4   :  { %1361 = vmatprep.subr.bf16.mxu1 %v1781_v38 }
  0xb5   :  { %832 = vmatpush1.bf16.msra.mxu0 %v1517_v2 }
  0xb6   :  { %833 = vmatprep.subr.bf16.mxu0 %v1522_v3 }
  0xb7   :  { %1362 = vmatpush3.bf16.msra.mxu1 %v1539_v22 }
  0xb8   :  { %1363 = vmatprep.subr.bf16.mxu1 %v1781_v38 }
  0xb9   :  { %834 = vmatpush1.bf16.msra.mxu0 %v1520_v4  ;;  %v925_v4 = vsub.s32 2, %v1955_v15 }
  0xba   :  { %835 = vmatprep.subr.bf16.mxu0 %v1525_v5  ;;  %v929_v5 = vsub.s32 3, %v1955_v15 }
  0xbb   :  { %1364 = vmatpush3.bf16.msra.mxu1 %v1540_v23 }
  0xbc   :  { %1365 = vmatprep.subr.bf16.mxu1 %v1781_v38 }
  0xbd   :  { %836 = vmatpush1.bf16.msra.mxu0 %v1523_v6  ;;  %v926_v6 = vrot.slane %v1961_v17, %v925_v4 }
  0xbe   :  { %837 = vmatprep.subr.bf16.mxu0 %v1528_v7 }
  0xbf   :  { %1366 = vmatpush3.bf16.msra.mxu1 %v1541_v24 }
  0xc0   :  { %1367 = vmatprep.subr.bf16.mxu1 %v1781_v38 }
  0xc1   :  { %838 = vmatpush1.bf16.msra.mxu0 %v1526_v8  ;;  %v930_v8 = vrot.slane %v1961_v17, %v929_v5 }
  0xc2   :  { %839 = vmatprep.subr.bf16.mxu0 %v1531_v9 }
  0xc3   :  { %1368 = vmatpush3.bf16.msra.mxu1 %v1542_v25 }
  0xc4   :  { %1369 = vmatprep.subr.bf16.mxu1 %v1781_v38 }
  0xc5   :  { %840 = vmatpush1.bf16.msra.mxu0 %v1529_v10 }
  0xc6   :  { %841 = vmatprep.subr.bf16.mxu0 %v1534_v0 }
  0xc7   :  { %1370 = vmatpush3.bf16.msra.mxu1 %v1543_v26 }
  0xc8   :  { %1371 = vmatprep.subr.bf16.mxu1 %v1781_v38 }
  0xc9   :  { %842 = vmatpush1.bf16.msra.mxu0 %v1532_v11 }
  0xca   :  { %843 = vmatprep.subr.bf16.mxu0 %v1537_v12 }
  0xcb   :  { %1372 = vmatpush3.bf16.msra.mxu1 %v1544_v27 }
  0xcc   :  { %1373 = vmatprep.subr.bf16.mxu1 %v1781_v38 }
  0xcd   :  { %844 = vmatpush1.bf16.msra.mxu0 %v1535_v13 }
  0xce   :  { %1379 = vmatprep.subr.bf16.mxu0 %v1781_v38 }
  0xcf   :  { %1374 = vmatpush3.bf16.msra.mxu1 %v1545_v28 }
  0xd0   :  { %862 = vmatmul.mubr.bf16.vlgmr.msra.gmra.mrb[8].mxu0 %v1943_v63  ;;  %1399 = vmatprep.subr.bf16.mxu1 %v1781_v38 }
  0xd1   :  { %1395 = vmatprep.mubr.msk.bf16.mxu0 %vm1782_vm0, %v1781_v38  ;;  %1380 = vmatpush3.bf16.msra.mxu0 %v1546_v29 }
  0xd2   :  { %1376 = vmatmul.mubr.bf16.vlgmr.msra.gmra.mrb[8].mxu1 %v1943_v63  ;;  %1381 = vmatprep.subr.bf16.mxu0 %v1781_v38 }
  0xd3   :  { %1415 = vmatprep.mubr.msk.bf16.mxu1 %vm1782_vm0, %v1781_v38  ;;  %1400 = vmatpush3.bf16.msra.mxu1 %v1547_v30 }
  0xd4   :  { %1401 = vmatprep.subr.bf16.mxu1 %v1781_v38 }
  0xd5   :  { %1382 = vmatpush3.bf16.msra.mxu0 %v1548_v31 }
  0xd6   :  { %1383 = vmatprep.subr.bf16.mxu0 %v1781_v38 }
  0xd7   :  { %1402 = vmatpush3.bf16.msra.mxu1 %v1549_v32 }
  0xd8   :  { %1403 = vmatprep.subr.bf16.mxu1 %v1781_v38 }
  0xd9   :  { %1384 = vmatpush3.bf16.msra.mxu0 %v1550_v34 }
  0xda   :  { %1385 = vmatprep.subr.bf16.mxu0 %v1781_v38 }
  0xdb   :  { %1404 = vmatpush3.bf16.msra.mxu1 %v1551_v35  ;;  %v1293_v35 = vld [vmem:[%s2044_s7] ss:$0 sm:$0xff]  ;;  %s1783_s7 = smov [#allocation14]  }
  0xdc   :  { %1405 = vmatprep.subr.bf16.mxu1 %v1781_v38 }
  0xdd   :  { %1386 = vmatpush3.bf16.msra.mxu0 %v1552_v36 }
  0xde   :  { %1387 = vmatprep.subr.bf16.mxu0 %v1781_v38 }
  0xdf   :  { %1406 = vmatpush3.bf16.msra.mxu1 %v1553_v37 }
  0xe0   :  { %1407 = vmatprep.subr.bf16.mxu1 %v1781_v38 }
  0xe1   :  { %1388 = vmatpush3.bf16.msra.mxu0 %v1554_v39 }
  0xe2   :  { %1389 = vmatprep.subr.bf16.mxu0 %v1781_v38 }
  0xe3   :  { %1408 = vmatpush3.bf16.msra.mxu1 %v1555_v40 }
  0xe4   :  { %1409 = vmatprep.subr.bf16.mxu1 %v1781_v38 }
  0xe5   :  { %1390 = vmatpush3.bf16.msra.mxu0 %v1556_v41  ;;  %v1302_v41 = vld [vmem:[%s2045_s8] ss:$0 sm:$0xff]  ;;  %s1185_s8 = sshll.u32 %s1783_s7, 4  ;;  %s1186_s8 = int_to_ptr.vmem [resolvable:$true] %s1185_s8 }
  0xe6   :  { %1391 = vmatprep.subr.bf16.mxu0 %v1781_v38  ;;  %s1714_s3 = scalar_lea.vmem %s1186_s8, 128  ;;  %p1719_p7 = scmp.lt.s32.totalorder %s1186_s8, %s1186_s8 }
  0xe7   :  { %1410 = vmatpush3.bf16.msra.mxu1 %v1557_v42  ;;  %p1715_p6 = scmp.ne.s32.totalorder %s1186_s8, %s1714_s3  ;;  %p1720_p8 = scmp.lt.s32.totalorder %s1714_s3, %s1714_s3 }
  0xe8   :  { %1411 = vmatprep.subr.bf16.mxu1 %v1781_v38 }
  0xe9   :  { %1392 = vmatpush3.bf16.msra.mxu0 %v1558_v43  ;;  %p1721_p9 = por %p1720_p8, %p1719_p7 }
  0xea   :  { %1393 = vmatprep.subr.bf16.mxu0 %v1781_v38 }
  0xeb   :  { %1412 = vmatpush3.bf16.msra.mxu1 %v1559_v44  ;;  %p1722_p10 = pnand %p1721_p9, %p1715_p6 }
  0xec   :  { %1413 = vmatprep.subr.bf16.mxu1 %v1781_v38 }
  0xed   :  { %1394 = vmatpush3.bf16.msra.mxu0 %v1560_v45 }
  0xef   :  { %1414 = vmatpush3.bf16.msra.mxu1 %v1561_v46 }
 0x163   :  { %v492_v47 = vpop.f32.mrb[0].mxu0  ;;  %v533_v48 = vpop.f32.mrb[0].mxu1 }
 0x164   :  { %v494_v49 = vpop.f32.mrb[1].mxu0  ;;  %v535_v50 = vpop.f32.mrb[1].mxu1 }
 0x165   :  { %v496_v51 = vpop.f32.mrb[2].mxu0  ;;  %v537_v52 = vpop.f32.mrb[2].mxu1 }
 0x166   :  { %v497_v53 = vpop.f32.mrb[3].mxu0  ;;  %v538_v54 = vpop.f32.mrb[3].mxu1 }
 0x183   :  { %v574_v55 = vpop.f32.mrb[4].mxu0  ;;  %v822_v56 = vpop.f32.mrb[4].mxu1 }
 0x184   :  { %v910_v57 = vadd.f32 %v822_v56, %v492_v47  ;;  %v1357_v58 = vpop.f32.mrb[5].mxu0  ;;  %v824_v59 = vpop.f32.mrb[5].mxu1 }
 0x185   :  { %v911_v61 = vadd.f32 %v824_v59, %v494_v49  ;;  %v577_v62 = vpop.f32.mrb[6].mxu0  ;;  %v826_v63 = vpop.f32.mrb[6].mxu1 }
 0x186   :  { %v935_v38 = vadd.f32 %v1965_v19, %v910_v57  ;;  %v1358_v1 = vpop.f32.mrb[7].mxu0  ;;  %v827_v2 = vpop.f32.mrb[7].mxu1 }
 0x187   :  { %v936_v3 = vadd.f32 %v1968_v21, %v911_v61 }
 0x188   :  { %v1281_v32 = vmul.f32 -1.442695, %v935_v38 }
 0x189   :  { %v1282_v31 = vmul.f32 -1.442695, %v936_v3 }
 0x1a3   :  { %v863_v7 = vpop.f32.mrb[8].mxu0 }
 0x1a4   :  { %v912_v9 = vadd.f32 %v863_v7, %v533_v48  ;;  %v865_v10 = vpop.f32.mrb[9].mxu0 }
 0x1a5   :  { %v913_v0 = vadd.f32 %v865_v10, %v535_v50  ;;  %v867_v11 = vpop.f32.mrb[10].mxu0  ;;  %v904_v27 = vpop.f32.mrb[8].mxu1 }
 0x1a6   :  { %v937_v12 = vadd.f32 %v926_v6, %v912_v9  ;;  %v868_v13 = vpop.f32.mrb[11].mxu0  ;;  %v1377_v28 = vpop.f32.mrb[9].mxu1 }
 0x1a7   :  { %v938_v14 = vadd.f32 %v930_v8, %v913_v0  ;;  %v907_v29 = vpop.f32.mrb[10].mxu1 }
 0x1a8   :  { %v1283_v16 = vmul.f32 -1.442695, %v937_v12  ;;  %v1378_v30 = vpop.f32.mrb[11].mxu1 }
 0x1a9   :  { %v1284_v18 = vmul.f32 -1.442695, %v938_v14 }
 0x1aa   :  { %1562 = vpow2.f32 %v1283_v16 }
 0x1ab   :  { %1564 = vpow2.f32 %v1284_v18 }
 0x1b4   :  { %v1563_v19 = vpop.eup %1562 }
 0x1b5   :  { %v1565_v20 = vpop.eup %1564  ;;  %v953_v21 = vadd.f32 1.0, %v1563_v19 }
 0x1b6   :  { %v954_v15 = vadd.f32 1.0, %v1565_v20 }
 0x1b7   :  { %1566 = vrcp.f32 %v953_v21 }
 0x1b8   :  { %1568 = vrcp.f32 %v954_v15 }
 0x1b9   :  { %1570 = vpow2.f32 %v1282_v31 }
 0x1ba   :  { %1572 = vpow2.f32 %v1281_v32 }
 0x1c1   :  { %v1567_v22 = vpop.eup %1566 }
 0x1c2   :  { %v1569_v23 = vpop.eup %1568  ;;  %v963_v17 = vmul.f32 %v1567_v22, %v1938_v60 }
 0x1c3   :  { %v1062_v24 = vmul.f32 %v1569_v23, %v1920_v33  ;;  %v1571_v34 = vpop.eup %1570 }
 0x1c4   :  { %v964_v25 = vpack.c.bf16 %v963_v17, %v963_v17  ;;  %v1573_v37 = vpop.eup %1572  ;;  %v952_v46 = vadd.f32 1.0, %v1571_v34 }
 0x1c5   :  { %v1063_v26 = vpack.c.bf16 %v1062_v24, %v1062_v24  ;;  %v951_v50 = vadd.f32 1.0, %v1573_v37 }
 0x1c6   :  { %1396 = vmatmul.mubr.bf16.vlgmr.msra.gmra.mrb[12].mxu0 %v964_v25 }
 0x1c7   :  { %1416 = vmatmul.mubr.bf16.vlgmr.msra.gmra.mrb[12].mxu1 %v1063_v26 }
 0x299   :  { %v1047_v36 = vpop.f32.mrb[12].mxu0 }
 0x29a   :  { %v1053_v39 = vadd.f32 %v1047_v36, %v574_v55  ;;  %v1397_v40 = vpop.f32.mrb[13].mxu0  ;;  %v1146_v42 = vpop.f32.mrb[12].mxu1 }
 0x29b   :  { %v1152_v43 = vadd.f32 %v1146_v42, %v904_v27  ;;  %v1050_v44 = vpop.f32.mrb[14].mxu0  ;;  %v1417_v45 = vpop.f32.mrb[13].mxu1 }
 0x29c   :  { %v1060_v47 = vadd.f32 %v1293_v35, %v1053_v39  ;;  %v1398_v48 = vpop.f32.mrb[15].mxu0  ;;  %v1149_v49 = vpop.f32.mrb[14].mxu1 }
 0x29d   :  { %v1159_v51 = vadd.f32 %v1302_v41, %v1152_v43  ;;  %v1418_v52 = vpop.f32.mrb[15].mxu1 }
 0x29e   :  { %1574 = vtanh.f32 %v1060_v47 }
 0x29f   :  { %1576 = vtanh.f32 %v1159_v51 }
 0x2a0   :  { %1578 = vrcp.f32 %v952_v46 }
 0x2a1   :  { %1580 = vrcp.f32 %v951_v50 }
 0x2a8   :  { %v1575_v53 = vpop.eup %1574 }
 0x2a9   :  { %v1577_v54 = vpop.eup %1576  ;;  %v1164_v55 = vsub.f32 %v1575_v53, %v1938_v60 }
 0x2aa   :  { %v1579_v56 = vpop.eup %1578  ;;  %v1161_v57 = vsub.f32 %v1577_v54, %v1920_v33 }
 0x2ab   :  { %v1581_v58 = vpop.eup %1580  ;;  %v1165_v59 = vmul.f32 %v1579_v56, %v1164_v55 }
 0x2ac   :  { %v1162_v61 = vmul.f32 %v1581_v58, %v1161_v57 }
 0x2ad   :  { %v1166_v62 = vadd.f32 %v1165_v59, %v1938_v60 }
 0x2ae   :  { %v1163_v63 = vadd.f32 %v1162_v61, %v1920_v33 }
 0x2af   :  { %1168 = vst [vmem:[#allocation14] sm:$0xff] %v1166_v62 }
 0x2b0   :  { %1167 = vst [vmem:[#allocation13] sm:$0xff] %v1163_v63 }
 0x2b1   :  { %1725 = shalt.err (!%p1722_p10)
}
 0x2b2   :  { %s1726_s2 = scalar_lea.hbm %s2047_s10, 128 }
 0x2b3   :  { %p1727_p11 = scmp.ne.s32.totalorder %s2047_s10, %s1726_s2  ;;  %p1730_p12 = scmp.lt.u32.totalorder %s1726_s2, %s2047_s10 }
 0x2b5   :  { %p1732_p13 = pnand %p1730_p12, %p1727_p11 }
 0x2b7   :  { %1735 = shalt.err (!%p1732_p13)
}
 0x2b8   :  { %1188 = dma.vmem_to_hbm [thread:$0]  %s1186_s8, 128, %s2047_s10, [#allocation15]  }
 0x2b9   :  { %s1736_s1 = scalar_lea.vmem %s1176_s29, 128  ;;  %p1741_p1 = scmp.lt.s32.totalorder %s1176_s29, %s1176_s29 }
 0x2ba   :  { %p1737_p0 = scmp.ne.s32.totalorder %s1176_s29, %s1736_s1  ;;  %p1742_p2 = scmp.lt.s32.totalorder %s1736_s1, %s1736_s1 }
 0x2bc   :  { %p1743_p3 = por %p1742_p2, %p1741_p1 }
 0x2be   :  { %p1744_p4 = pnand %p1743_p3, %p1737_p0 }
 0x2c0   :  { %1747 = shalt.err (!%p1744_p4)
}
 0x2c1   :  { %s1748_s20 = scalar_lea.hbm %s2046_s9, 128 }
 0x2c2   :  { %p1749_p5 = scmp.ne.s32.totalorder %s2046_s9, %s1748_s20  ;;  %p1752_p6 = scmp.lt.u32.totalorder %s1748_s20, %s2046_s9 }
 0x2c4   :  { %p1754_p7 = pnand %p1752_p6, %p1749_p5 }
 0x2c6   :  { %1757 = shalt.err (!%p1754_p7)
}
 0x2c7   :  { %1178 = dma.vmem_to_hbm [thread:$0]  %s1176_s29, 128, %s2046_s9, [#allocation4]  }
 0x2c8   :  { %1766 = dma.done.wait [#allocation4], 128  }
 0x2c9   :  { %1767 = vsyncadd [#allocation4], 4294967168 }
 0x2ca   :  { %1768 = dma.done.wait [#allocation15], 128  }
 0x2cb   :  { %1769 = vsyncadd [#allocation15], 4294967168 }
 0x2cc   :  { %1195 = vsyncpa [#allocation3], 1 }
 0x2cd   :  { %1196 = vsyncpa [#allocation6], 1 }
 0x2ce   :  { %1197 = vsyncpa [#allocation9], 1 }
 0x2cf   :  { %1198 = vsyncpa [#allocation12], 1 }
 0x2d0   :  { %1199 = vsyncpa [#allocation4], 1 }
 0x2d1   :  { %1200 = vsyncpa [#allocation15], 1 }

</bundles_post_ra>
